<compile_context>
chip_gen: v7x
topology: tpu7x:2x2x1
jax: 0.10.0
libtpu: 0.0.40
codegen_flags: <defaults>
</compile_context>

<pallas_src>
import jax
import jax.numpy as jnp
from jax import lax
from jax.experimental import pallas as pl
from jax.experimental.pallas import tpu as pltpu

# ----------------------------- config ---------------------------------------
B = 2                       # batch
C = 3                       # image channels
H = W = 32                  # image spatial
P = 8                       # patch size
N_PATCH = (H // P) * (W // P)        # 16 patches
PATCH_DIM = C * P * P                # 192 (multiple of 8 sublanes; no zero pad)
D = 64                      # model / embedding dim
E = 64                      # image embedding dim (== cond dim)
L = 64                      # diffusion latent dim (== decoder memory dim)
T_STEPS = 4                 # diffusion denoising steps
HID = 128                   # diffusion denoiser hidden
S = 8                       # decoder sequence length (learned queries)
FF = 128                    # decoder feed-forward hidden
N_CMD = 8                   # command-logit width
N_ARGS = 64                 # flattened args-logit width
HEAD = 128                  # packed cmd(8)+args(64) head, zero-padded lane-dense

# ---- packed weight slab layout (slice starts on 128-lane boundaries) --------
# w64 slab: leading dim 64, bf16, shape (64, 576)
OFF_W1X = 0        # (64,128) diffusion x-projection
OFF_WC = 128       # (64,128) fused cond projection  (w_proj @ w1c)
OFF_WF1 = 256      # (64,128) decoder FFN up
OFF_WHEAD = 384    # (64,128) merged cmd(8)+args(64) output head
OFF_WVO = 512      # (64, 64) fused value/output projection (wv @ wo)
W64_WIDTH = 576    # dead tail columns trimmed (was 896)
# wstk slab: two leading-dim-128 weights stacked along sublanes, bf16 (256, 64)
#   rows   0:128  -> 0.1 * w2  (diffusion eps head, step size pre-folded)
#   rows 128:256  -> wf2       (decoder FFN down)
# bias / small-tensor slab: (24, 128) f32, one logical tensor per row (group)
ROW_B_PATCH = 0    # b_patch                         [:D]
ROW_BHC = 1        # fused bias b_proj@w1c + b1      [:HID]
ROW_TEMB = 2       # t_emb, rows 2..5                [:HID]
ROW_B2 = 6         # 0.1 * b2                        [:L]
ROW_G1 = 7         # LN1 gain                        [:D]
ROW_BE1 = 8        # LN1 bias                        [:D]
ROW_BF1 = 9        # FFN b1                          [:FF]
ROW_BF2 = 10       # FFN b2                          [:D]
ROW_G2 = 11        # LN2 gain                        [:D]
ROW_BE2 = 12       # LN2 bias                        [:D]
ROW_BHEAD = 13     # merged head bias                [:HEAD]
ROW_QEMB = 16      # learned queries, rows 16..23    [:D]
SLAB_ROWS = 24


def _full_spec(shape):
    nd = len(shape)
    return pl.BlockSpec(shape, lambda *_: (0,) * nd)


# --------------------- fused GenCADSuperModel kernel -------------------------
def gencad_kernel(patches_ref, x0_ref, w_patch_ref, w64_ref, wstk_ref,
                  bias_ref, out_ref):
    f32 = jnp.float32
    bf16 = jnp.bfloat16

    def bdot(a, b):
        # bf16 x bf16 MXU matmul, f32 accumulation
        return jnp.dot(a.astype(bf16), b, preferred_element_type=f32)

    # ---------------- stage 1: CLIP image embedding (normalization=False) ----
    tok = bdot(patches_ref[...], w_patch_ref[...])            # (B*N_PATCH, D)
    tok = jnp.maximum(tok + bias_ref[ROW_B_PATCH:ROW_B_PATCH + 1, :D], 0.0)
    # mean-pool over patches per image: tile-aligned reshape + sublane mean
    pooled = jnp.mean(tok.reshape(B, N_PATCH, D), axis=1)     # (B, D)

    # ---------------- stage 2: diffusion sampling (cond = image embed) -------
    # w_proj@w1c and b_proj@w1c + b1 were folded at init into WC / ROW_BHC, so
    # the image-embedding projection and the denoiser cond-projection are one
    # matmul here.
    hc = bdot(pooled, w64_ref[:, OFF_WC:OFF_WC + HID]) \
        + bias_ref[ROW_BHC:ROW_BHC + 1, :]                    # (B, HID)
    w1x = w64_ref[:, OFF_W1X:OFF_W1X + HID]                   # hoisted
    w2s = wstk_ref[0:HID, :]                                  # 0.1*w2, hoisted
    b2s = bias_ref[ROW_B2:ROW_B2 + 1, :L]                     # 0.1*b2, hoisted
    temb = bias_ref[ROW_TEMB:ROW_TEMB + T_STEPS, :]           # (T_STEPS, HID)
    x = x0_ref[...]                                           # (B, L) f32
    # TODO(synk): DDPM per-step stochastic noise injection omitted;
    # deterministic eps-prediction update used instead (structure preserved).
    for t in range(T_STEPS):                                  # static unroll
        h = jnp.maximum(bdot(x, w1x) + hc + temb[t:t + 1, :], 0.0)
        x = x - (bdot(h, w2s) + b2s)                          # 0.1 pre-folded
    latent = x                                                # (B, L)

    # ---------------- stage 3: CAD transformer decoder -----------------------
    # Cross-attention over a length-1 memory: softmax weight is identically 1,
    # so attn_out == v and q/k projections drop out bit-identically; wv@wo was
    # folded at init into WVO.
    ctx = bdot(latent, w64_ref[:, OFF_WVO:OFF_WVO + D])       # (B, D)
    qe = bias_ref[ROW_QEMB:ROW_QEMB + S, :D]                  # (S, D)
    # residual: learned queries + broadcast attention context, all batches
    xdec = (qe[None, :, :] + ctx[:, None, :]).reshape(B * S, D)

    def layer_norm(y, g, b):
        mu = jnp.mean(y, axis=-1, keepdims=True)
        var = jnp.mean((y - mu) ** 2, axis=-1, keepdims=True)
        return (y - mu) * lax.rsqrt(var + 1e-5) * g + b

    xdec = layer_norm(xdec, bias_ref[ROW_G1:ROW_G1 + 1, :D],
                      bias_ref[ROW_BE1:ROW_BE1 + 1, :D])
    ff = jnp.maximum(bdot(xdec, w64_ref[:, OFF_WF1:OFF_WF1 + FF])
                     + bias_ref[ROW_BF1:ROW_BF1 + 1, :FF], 0.0)
    ff = bdot(ff, wstk_ref[HID:HID + FF, :]) \
        + bias_ref[ROW_BF2:ROW_BF2 + 1, :D]
    xdec = layer_norm(xdec + ff, bias_ref[ROW_G2:ROW_G2 + 1, :D],
                      bias_ref[ROW_BE2:ROW_BE2 + 1, :D])

    # merged cmd/args head -> lane-dense (B*S, 128) unmasked store
    out_ref[...] = bdot(xdec, w64_ref[:, OFF_WHEAD:OFF_WHEAD + HEAD]) \
        + bias_ref[ROW_BHEAD:ROW_BHEAD + 1, :]


# ----------------------- parameters (deterministic) --------------------------
def init_params(key, batch=B):
    ks = jax.random.split(key, 16)
    bf16 = jnp.bfloat16

    def w(k, shape, scale=0.02):
        return (scale * jax.random.normal(k, shape)).astype(jnp.float32)

    # CLIP patch-embed weight: K kept at 192 (no zero-padding), bf16
    w_patch = w(ks[0], (PATCH_DIM, D)).astype(bf16)

    # raw component weights (f32), folded / packed / cast below
    w_proj = w(ks[1], (D, E))          # clip projection
    w1x = w(ks[2], (L, HID))           # diffusion x-projection
    w1c = w(ks[3], (E, HID))           # diffusion cond-projection
    w2 = w(ks[5], (HID, L))            # diffusion eps head
    wv = w(ks[9], (D, D))              # decoder value projection
    wo = w(ks[10], (D, D))             # decoder output projection
    wf1 = w(ks[11], (D, FF))           # decoder FFN up
    wf2 = w(ks[12], (FF, D))           # decoder FFN down
    wc_cmd = w(ks[13], (D, N_CMD))     # cmd head
    wc_args = w(ks[14], (D, N_ARGS))   # args head

    # fold adjacent linear layers -> shorter dependent-matmul chain in-kernel
    wc_fused = w_proj @ w1c            # (D, HID): pooled -> hc in one matmul
    wvo_fused = wv @ wo                # (D, D)  : latent -> ctx in one matmul
    w2_scaled = 0.1 * w2               # fold diffusion step size into w2

    # leading-dim-64 weight slab (bf16), dead tail columns trimmed
    w64 = jnp.zeros((D, W64_WIDTH), jnp.float32)
    w64 = w64.at[:, OFF_W1X:OFF_W1X + HID].set(w1x)
    w64 = w64.at[:, OFF_WC:OFF_WC + HID].set(wc_fused)
    w64 = w64.at[:, OFF_WF1:OFF_WF1 + FF].set(wf1)
    w64 = w64.at[:, OFF_WHEAD:OFF_WHEAD + N_CMD].set(wc_cmd)
    w64 = w64.at[:, OFF_WHEAD + N_CMD:OFF_WHEAD + N_CMD + N_ARGS].set(wc_args)
    w64 = w64.at[:, OFF_WVO:OFF_WVO + D].set(wvo_fused)
    w64 = w64.astype(bf16)

    # leading-dim-128 weights stacked along sublanes (fully dense, bf16)
    wstk = jnp.zeros((HID + FF, 64), jnp.float32)
    wstk = wstk.at[:HID, :L].set(w2_scaled)
    wstk = wstk.at[HID:HID + FF, :D].set(wf2)
    wstk = wstk.astype(bf16)

    # small-tensor slab: biases 0, LN gains 1, t_emb / q_emb random (f32)
    # NOTE: b_patch, fused (b_proj@w1c + b1), 0.1*b2, FFN and head biases are
    # zero in this synthetic init; real weights would be folded into these rows.
    bias = jnp.zeros((SLAB_ROWS, 128), jnp.float32)
    bias = bias.at[ROW_G1, :D].set(1.0)
    bias = bias.at[ROW_G2, :D].set(1.0)
    bias = bias.at[ROW_TEMB:ROW_TEMB + T_STEPS, :HID].set(
        w(ks[4], (T_STEPS, HID), 0.1))
    bias = bias.at[ROW_QEMB:ROW_QEMB + S, :D].set(w(ks[6], (S, D), 0.1))

    # fixed diffusion starting latent, precomputed once (not per-forward)
    x0 = jax.random.normal(jax.random.PRNGKey(1), (batch, L), jnp.float32)

    return {"w_patch": w_patch, "w64": w64, "wstk": wstk, "bias": bias,
            "x0": x0}


# ----------------------- full GenCADSuperModel forward -----------------------
@jax.jit
def gencad_super_forward(img, params):
    b = img.shape[0]
    # patchify NCHW -> (B*N_PATCH, C*P*P) bf16; K stays 192 (no zero pad)
    x = img.reshape(b, C, H // P, P, W // P, P).transpose(0, 2, 4, 1, 3, 5)
    patches = x.reshape(b * N_PATCH, PATCH_DIM).astype(jnp.bfloat16)

    args = (patches, params["x0"], params["w_patch"], params["w64"],
            params["wstk"], params["bias"])
    out = pl.pallas_call(
        gencad_kernel,
        out_shape=jax.ShapeDtypeStruct((b * S, HEAD), jnp.float32),
        grid_spec=pltpu.PrefetchScalarGridSpec(
            num_scalar_prefetch=0,
            # grid=(1,): whole problem fits one TensorCore invocation (<1 MB
            # resident, fine on v5e/v6e 128 MiB and v7x 64 MiB VMEM). If batch
            # ever grows, add a leading 'parallel' batch axis for v7x's 2 TCs.
            grid=(1,),
            in_specs=[_full_spec(a.shape) for a in args],
            out_specs=_full_spec((b * S, HEAD))),
        compiler_params=pltpu.CompilerParams(
            dimension_semantics=("arbitrary",)),
    )(*args)

    out = out.reshape(b, S, HEAD)
    cmd_logits = out[:, :, :N_CMD]
    args_logits = out[:, :, N_CMD:N_CMD + N_ARGS]
    return cmd_logits, args_logits


if __name__ == "__main__":
    key = jax.random.PRNGKey(0)
    img = jax.random.normal(key, (B, C, H, W), jnp.float32)   # NCHW like PyTorch
    params = init_params(jax.random.PRNGKey(42))
    cmd_logits, args_logits = gencad_super_forward(img, params)
    jax.block_until_ready((cmd_logits, args_logits))
    assert cmd_logits.shape == (B, S, N_CMD)
    assert args_logits.shape == (B, S, N_ARGS)
    print("KERNEL_OK")
</pallas_src>

<mosaic_0001>
module attributes {stable_mosaic.version = 11 : i64} {
  func.func @gencad_kernel(%arg0: i32, %arg1: memref<32x192xbf16, #tpu.memory_space<vmem>>, %arg2: memref<2x64xf32, #tpu.memory_space<vmem>>, %arg3: memref<192x64xbf16, #tpu.memory_space<vmem>>, %arg4: memref<64x576xbf16, #tpu.memory_space<vmem>>, %arg5: memref<256x64xbf16, #tpu.memory_space<vmem>>, %arg6: memref<24x128xf32, #tpu.memory_space<vmem>>, %arg7: memref<16x128xf32, #tpu.memory_space<vmem>>) attributes {dimension_semantics = [#tpu.dimension_semantics<arbitrary>], iteration_bounds = array<i64: 1>, scalar_prefetch = 0 : i64, scratch_operands = 0 : i64, tpu.core_type = #tpu.core_type<tc>, window_params = [{pipeline_mode = #tpu.pipeline_mode<synchronous>, transform_indices = @transform_0, window_bounds = array<i64: 32, 192>}, {pipeline_mode = #tpu.pipeline_mode<synchronous>, transform_indices = @transform_1, window_bounds = array<i64: 2, 64>}, {pipeline_mode = #tpu.pipeline_mode<synchronous>, transform_indices = @transform_2, window_bounds = array<i64: 192, 64>}, {pipeline_mode = #tpu.pipeline_mode<synchronous>, transform_indices = @transform_3, window_bounds = array<i64: 64, 576>}, {pipeline_mode = #tpu.pipeline_mode<synchronous>, transform_indices = @transform_4, window_bounds = array<i64: 256, 64>}, {pipeline_mode = #tpu.pipeline_mode<synchronous>, transform_indices = @transform_5, window_bounds = array<i64: 24, 128>}, {pipeline_mode = #tpu.pipeline_mode<synchronous>, transform_indices = @transform_6, window_bounds = array<i64: 16, 128>}]} {
    %c0 = arith.constant 0 : index
    %c0_0 = arith.constant 0 : index
    %0 = vector.load %arg1[%c0, %c0_0] : memref<32x192xbf16, #tpu.memory_space<vmem>>, vector<32x192xbf16>
    %c0_1 = arith.constant 0 : index
    %c0_2 = arith.constant 0 : index
    %1 = vector.load %arg3[%c0_1, %c0_2] : memref<192x64xbf16, #tpu.memory_space<vmem>>, vector<192x64xbf16>
    %cst = arith.constant dense<0.000000e+00> : vector<32x64xf32>
    %2 = tpu.matmul %0, %1, %cst {dimension_numbers = #tpu.dot_dimension_numbers<[1], [0], [0], [1], [0, 0, 1, 1], [], []>} : vector<32x192xbf16>, vector<192x64xbf16>, vector<32x64xf32> -> vector<32x64xf32>
    %c0_3 = arith.constant 0 : index
    %c0_4 = arith.constant 0 : index
    %3 = vector.load %arg6[%c0_3, %c0_4] : memref<24x128xf32, #tpu.memory_space<vmem>>, vector<1x64xf32>
    %4 = vector.broadcast %3 : vector<1x64xf32> to vector<32x64xf32>
    %5 = arith.addf %2, %4 : vector<32x64xf32>
    %cst_5 = arith.constant 0.000000e+00 : f32
    %6 = vector.broadcast %cst_5 : f32 to vector<32x64xf32>
    %7 = arith.maximumf %5, %6 : vector<32x64xf32>
    %8 = vector.shape_cast %7 : vector<32x64xf32> to vector<2x16x64xf32>
    %cst_6 = arith.constant dense<0.000000e+00> : vector<2x64xf32>
    %9 = vector.multi_reduction <add>, %8, %cst_6 [1] : vector<2x16x64xf32> to vector<2x64xf32>
    %cst_7 = arith.constant 1.600000e+01 : f32
    %10 = vector.broadcast %cst_7 : f32 to vector<2x64xf32>
    %11 = arith.divf %9, %10 : vector<2x64xf32>
    %c0_8 = arith.constant 0 : index
    %c128 = arith.constant 128 : index
    %12 = vector.load %arg4[%c0_8, %c128] : memref<64x576xbf16, #tpu.memory_space<vmem>>, vector<64x128xbf16>
    %13 = arith.truncf %11 : vector<2x64xf32> to vector<2x64xbf16>
    %cst_9 = arith.constant dense<0.000000e+00> : vector<2x128xf32>
    %14 = tpu.matmul %13, %12, %cst_9 {dimension_numbers = #tpu.dot_dimension_numbers<[1], [0], [0], [1], [0, 0, 1, 1], [], []>} : vector<2x64xbf16>, vector<64x128xbf16>, vector<2x128xf32> -> vector<2x128xf32>
    %c1 = arith.constant 1 : index
    %c0_10 = arith.constant 0 : index
    %15 = vector.load %arg6[%c1, %c0_10] : memref<24x128xf32, #tpu.memory_space<vmem>>, vector<1x128xf32>
    %16 = vector.broadcast %15 : vector<1x128xf32> to vector<2x128xf32>
    %17 = arith.addf %14, %16 : vector<2x128xf32>
    %c0_11 = arith.constant 0 : index
    %c0_12 = arith.constant 0 : index
    %18 = vector.load %arg4[%c0_11, %c0_12] : memref<64x576xbf16, #tpu.memory_space<vmem>>, vector<64x128xbf16>
    %c0_13 = arith.constant 0 : index
    %c0_14 = arith.constant 0 : index
    %19 = vector.load %arg5[%c0_13, %c0_14] : memref<256x64xbf16, #tpu.memory_space<vmem>>, vector<128x64xbf16>
    %c6 = arith.constant 6 : index
    %c0_15 = arith.constant 0 : index
    %20 = vector.load %arg6[%c6, %c0_15] : memref<24x128xf32, #tpu.memory_space<vmem>>, vector<1x64xf32>
    %c2 = arith.constant 2 : index
    %c0_16 = arith.constant 0 : index
    %21 = vector.load %arg6[%c2, %c0_16] : memref<24x128xf32, #tpu.memory_space<vmem>>, vector<4x128xf32>
    %c0_17 = arith.constant 0 : index
    %c0_18 = arith.constant 0 : index
    %22 = vector.load %arg2[%c0_17, %c0_18] : memref<2x64xf32, #tpu.memory_space<vmem>>, vector<2x64xf32>
    %23 = arith.truncf %22 : vector<2x64xf32> to vector<2x64xbf16>
    %cst_19 = arith.constant dense<0.000000e+00> : vector<2x128xf32>
    %24 = tpu.matmul %23, %18, %cst_19 {dimension_numbers = #tpu.dot_dimension_numbers<[1], [0], [0], [1], [0, 0, 1, 1], [], []>} : vector<2x64xbf16>, vector<64x128xbf16>, vector<2x128xf32> -> vector<2x128xf32>
    %25 = arith.addf %24, %17 : vector<2x128xf32>
    %26 = vector.extract_strided_slice %21 {offsets = [0, 0], sizes = [1, 128], strides = [1, 1]} : vector<4x128xf32> to vector<1x128xf32>
    %27 = vector.broadcast %26 : vector<1x128xf32> to vector<2x128xf32>
    %28 = arith.addf %25, %27 : vector<2x128xf32>
    %cst_20 = arith.constant 0.000000e+00 : f32
    %29 = vector.broadcast %cst_20 : f32 to vector<2x128xf32>
    %30 = arith.maximumf %28, %29 : vector<2x128xf32>
    %31 = arith.truncf %30 : vector<2x128xf32> to vector<2x128xbf16>
    %cst_21 = arith.constant dense<0.000000e+00> : vector<2x64xf32>
    %32 = tpu.matmul %31, %19, %cst_21 {dimension_numbers = #tpu.dot_dimension_numbers<[1], [0], [0], [1], [0, 0, 1, 1], [], []>} : vector<2x128xbf16>, vector<128x64xbf16>, vector<2x64xf32> -> vector<2x64xf32>
    %33 = vector.broadcast %20 : vector<1x64xf32> to vector<2x64xf32>
    %34 = arith.addf %32, %33 : vector<2x64xf32>
    %35 = arith.subf %22, %34 : vector<2x64xf32>
    %36 = arith.truncf %35 : vector<2x64xf32> to vector<2x64xbf16>
    %cst_22 = arith.constant dense<0.000000e+00> : vector<2x128xf32>
    %37 = tpu.matmul %36, %18, %cst_22 {dimension_numbers = #tpu.dot_dimension_numbers<[1], [0], [0], [1], [0, 0, 1, 1], [], []>} : vector<2x64xbf16>, vector<64x128xbf16>, vector<2x128xf32> -> vector<2x128xf32>
    %38 = arith.addf %37, %17 : vector<2x128xf32>
    %39 = vector.extract_strided_slice %21 {offsets = [1, 0], sizes = [1, 128], strides = [1, 1]} : vector<4x128xf32> to vector<1x128xf32>
    %40 = vector.broadcast %39 : vector<1x128xf32> to vector<2x128xf32>
    %41 = arith.addf %38, %40 : vector<2x128xf32>
    %cst_23 = arith.constant 0.000000e+00 : f32
    %42 = vector.broadcast %cst_23 : f32 to vector<2x128xf32>
    %43 = arith.maximumf %41, %42 : vector<2x128xf32>
    %44 = arith.truncf %43 : vector<2x128xf32> to vector<2x128xbf16>
    %cst_24 = arith.constant dense<0.000000e+00> : vector<2x64xf32>
    %45 = tpu.matmul %44, %19, %cst_24 {dimension_numbers = #tpu.dot_dimension_numbers<[1], [0], [0], [1], [0, 0, 1, 1], [], []>} : vector<2x128xbf16>, vector<128x64xbf16>, vector<2x64xf32> -> vector<2x64xf32>
    %46 = vector.broadcast %20 : vector<1x64xf32> to vector<2x64xf32>
    %47 = arith.addf %45, %46 : vector<2x64xf32>
    %48 = arith.subf %35, %47 : vector<2x64xf32>
    %49 = arith.truncf %48 : vector<2x64xf32> to vector<2x64xbf16>
    %cst_25 = arith.constant dense<0.000000e+00> : vector<2x128xf32>
    %50 = tpu.matmul %49, %18, %cst_25 {dimension_numbers = #tpu.dot_dimension_numbers<[1], [0], [0], [1], [0, 0, 1, 1], [], []>} : vector<2x64xbf16>, vector<64x128xbf16>, vector<2x128xf32> -> vector<2x128xf32>
    %51 = arith.addf %50, %17 : vector<2x128xf32>
    %52 = vector.extract_strided_slice %21 {offsets = [2, 0], sizes = [1, 128], strides = [1, 1]} : vector<4x128xf32> to vector<1x128xf32>
    %53 = vector.broadcast %52 : vector<1x128xf32> to vector<2x128xf32>
    %54 = arith.addf %51, %53 : vector<2x128xf32>
    %cst_26 = arith.constant 0.000000e+00 : f32
    %55 = vector.broadcast %cst_26 : f32 to vector<2x128xf32>
    %56 = arith.maximumf %54, %55 : vector<2x128xf32>
    %57 = arith.truncf %56 : vector<2x128xf32> to vector<2x128xbf16>
    %cst_27 = arith.constant dense<0.000000e+00> : vector<2x64xf32>
    %58 = tpu.matmul %57, %19, %cst_27 {dimension_numbers = #tpu.dot_dimension_numbers<[1], [0], [0], [1], [0, 0, 1, 1], [], []>} : vector<2x128xbf16>, vector<128x64xbf16>, vector<2x64xf32> -> vector<2x64xf32>
    %59 = vector.broadcast %20 : vector<1x64xf32> to vector<2x64xf32>
    %60 = arith.addf %58, %59 : vector<2x64xf32>
    %61 = arith.subf %48, %60 : vector<2x64xf32>
    %62 = arith.truncf %61 : vector<2x64xf32> to vector<2x64xbf16>
    %cst_28 = arith.constant dense<0.000000e+00> : vector<2x128xf32>
    %63 = tpu.matmul %62, %18, %cst_28 {dimension_numbers = #tpu.dot_dimension_numbers<[1], [0], [0], [1], [0, 0, 1, 1], [], []>} : vector<2x64xbf16>, vector<64x128xbf16>, vector<2x128xf32> -> vector<2x128xf32>
    %64 = arith.addf %63, %17 : vector<2x128xf32>
    %65 = vector.extract_strided_slice %21 {offsets = [3, 0], sizes = [1, 128], strides = [1, 1]} : vector<4x128xf32> to vector<1x128xf32>
    %66 = vector.broadcast %65 : vector<1x128xf32> to vector<2x128xf32>
    %67 = arith.addf %64, %66 : vector<2x128xf32>
    %cst_29 = arith.constant 0.000000e+00 : f32
    %68 = vector.broadcast %cst_29 : f32 to vector<2x128xf32>
    %69 = arith.maximumf %67, %68 : vector<2x128xf32>
    %70 = arith.truncf %69 : vector<2x128xf32> to vector<2x128xbf16>
    %cst_30 = arith.constant dense<0.000000e+00> : vector<2x64xf32>
    %71 = tpu.matmul %70, %19, %cst_30 {dimension_numbers = #tpu.dot_dimension_numbers<[1], [0], [0], [1], [0, 0, 1, 1], [], []>} : vector<2x128xbf16>, vector<128x64xbf16>, vector<2x64xf32> -> vector<2x64xf32>
    %72 = vector.broadcast %20 : vector<1x64xf32> to vector<2x64xf32>
    %73 = arith.addf %71, %72 : vector<2x64xf32>
    %74 = arith.subf %61, %73 : vector<2x64xf32>
    %c0_31 = arith.constant 0 : index
    %c512 = arith.constant 512 : index
    %75 = vector.load %arg4[%c0_31, %c512] : memref<64x576xbf16, #tpu.memory_space<vmem>>, vector<64x64xbf16>
    %76 = arith.truncf %74 : vector<2x64xf32> to vector<2x64xbf16>
    %cst_32 = arith.constant dense<0.000000e+00> : vector<2x64xf32>
    %77 = tpu.matmul %76, %75, %cst_32 {dimension_numbers = #tpu.dot_dimension_numbers<[1], [0], [0], [1], [0, 0, 1, 1], [], []>} : vector<2x64xbf16>, vector<64x64xbf16>, vector<2x64xf32> -> vector<2x64xf32>
    %c16 = arith.constant 16 : index
    %c0_33 = arith.constant 0 : index
    %78 = vector.load %arg6[%c16, %c0_33] : memref<24x128xf32, #tpu.memory_space<vmem>>, vector<8x64xf32>
    %79 = vector.shape_cast %78 : vector<8x64xf32> to vector<1x8x64xf32>
    %80 = vector.shape_cast %77 : vector<2x64xf32> to vector<2x1x64xf32>
    %81 = vector.broadcast %79 : vector<1x8x64xf32> to vector<2x8x64xf32>
    %82 = vector.broadcast %80 : vector<2x1x64xf32> to vector<2x8x64xf32>
    %83 = arith.addf %81, %82 : vector<2x8x64xf32>
    %84 = vector.shape_cast %83 : vector<2x8x64xf32> to vector<16x64xf32>
    %c7 = arith.constant 7 : index
    %c0_34 = arith.constant 0 : index
    %85 = vector.load %arg6[%c7, %c0_34] : memref<24x128xf32, #tpu.memory_space<vmem>>, vector<1x64xf32>
    %c8 = arith.constant 8 : index
    %c0_35 = arith.constant 0 : index
    %86 = vector.load %arg6[%c8, %c0_35] : memref<24x128xf32, #tpu.memory_space<vmem>>, vector<1x64xf32>
    %cst_36 = arith.constant dense<0.000000e+00> : vector<16xf32>
    %87 = vector.multi_reduction <add>, %84, %cst_36 [1] : vector<16x64xf32> to vector<16xf32>
    %88 = vector.shape_cast %87 : vector<16xf32> to vector<16x1xf32>
    %cst_37 = arith.constant 6.400000e+01 : f32
    %89 = vector.broadcast %cst_37 : f32 to vector<16x1xf32>
    %90 = arith.divf %88, %89 : vector<16x1xf32>
    %91 = vector.broadcast %90 : vector<16x1xf32> to vector<16x64xf32>
    %92 = arith.subf %84, %91 : vector<16x64xf32>
    %93 = arith.mulf %92, %92 : vector<16x64xf32>
    %cst_38 = arith.constant dense<0.000000e+00> : vector<16xf32>
    %94 = vector.multi_reduction <add>, %93, %cst_38 [1] : vector<16x64xf32> to vector<16xf32>
    %95 = vector.shape_cast %94 : vector<16xf32> to vector<16x1xf32>
    %cst_39 = arith.constant 6.400000e+01 : f32
    %96 = vector.broadcast %cst_39 : f32 to vector<16x1xf32>
    %97 = arith.divf %95, %96 : vector<16x1xf32>
    %98 = vector.broadcast %90 : vector<16x1xf32> to vector<16x64xf32>
    %99 = arith.subf %84, %98 : vector<16x64xf32>
    %cst_40 = arith.constant 9.99999974E-6 : f32
    %100 = vector.broadcast %cst_40 : f32 to vector<16x1xf32>
    %101 = arith.addf %97, %100 : vector<16x1xf32>
    %102 = math.rsqrt %101 : vector<16x1xf32>
    %103 = vector.broadcast %102 : vector<16x1xf32> to vector<16x64xf32>
    %104 = arith.mulf %99, %103 : vector<16x64xf32>
    %105 = vector.broadcast %85 : vector<1x64xf32> to vector<16x64xf32>
    %106 = arith.mulf %104, %105 : vector<16x64xf32>
    %107 = vector.broadcast %86 : vector<1x64xf32> to vector<16x64xf32>
    %108 = arith.addf %106, %107 : vector<16x64xf32>
    %c0_41 = arith.constant 0 : index
    %c256 = arith.constant 256 : index
    %109 = vector.load %arg4[%c0_41, %c256] : memref<64x576xbf16, #tpu.memory_space<vmem>>, vector<64x128xbf16>
    %110 = arith.truncf %108 : vector<16x64xf32> to vector<16x64xbf16>
    %cst_42 = arith.constant dense<0.000000e+00> : vector<16x128xf32>
    %111 = tpu.matmul %110, %109, %cst_42 {dimension_numbers = #tpu.dot_dimension_numbers<[1], [0], [0], [1], [0, 0, 1, 1], [], []>} : vector<16x64xbf16>, vector<64x128xbf16>, vector<16x128xf32> -> vector<16x128xf32>
    %c9 = arith.constant 9 : index
    %c0_43 = arith.constant 0 : index
    %112 = vector.load %arg6[%c9, %c0_43] : memref<24x128xf32, #tpu.memory_space<vmem>>, vector<1x128xf32>
    %113 = vector.broadcast %112 : vector<1x128xf32> to vector<16x128xf32>
    %114 = arith.addf %111, %113 : vector<16x128xf32>
    %cst_44 = arith.constant 0.000000e+00 : f32
    %115 = vector.broadcast %cst_44 : f32 to vector<16x128xf32>
    %116 = arith.maximumf %114, %115 : vector<16x128xf32>
    %c128_45 = arith.constant 128 : index
    %c0_46 = arith.constant 0 : index
    %117 = vector.load %arg5[%c128_45, %c0_46] : memref<256x64xbf16, #tpu.memory_space<vmem>>, vector<128x64xbf16>
    %118 = arith.truncf %116 : vector<16x128xf32> to vector<16x128xbf16>
    %cst_47 = arith.constant dense<0.000000e+00> : vector<16x64xf32>
    %119 = tpu.matmul %118, %117, %cst_47 {dimension_numbers = #tpu.dot_dimension_numbers<[1], [0], [0], [1], [0, 0, 1, 1], [], []>} : vector<16x128xbf16>, vector<128x64xbf16>, vector<16x64xf32> -> vector<16x64xf32>
    %c10 = arith.constant 10 : index
    %c0_48 = arith.constant 0 : index
    %120 = vector.load %arg6[%c10, %c0_48] : memref<24x128xf32, #tpu.memory_space<vmem>>, vector<1x64xf32>
    %121 = vector.broadcast %120 : vector<1x64xf32> to vector<16x64xf32>
    %122 = arith.addf %119, %121 : vector<16x64xf32>
    %123 = arith.addf %108, %122 : vector<16x64xf32>
    %c11 = arith.constant 11 : index
    %c0_49 = arith.constant 0 : index
    %124 = vector.load %arg6[%c11, %c0_49] : memref<24x128xf32, #tpu.memory_space<vmem>>, vector<1x64xf32>
    %c12 = arith.constant 12 : index
    %c0_50 = arith.constant 0 : index
    %125 = vector.load %arg6[%c12, %c0_50] : memref<24x128xf32, #tpu.memory_space<vmem>>, vector<1x64xf32>
    %cst_51 = arith.constant dense<0.000000e+00> : vector<16xf32>
    %126 = vector.multi_reduction <add>, %123, %cst_51 [1] : vector<16x64xf32> to vector<16xf32>
    %127 = vector.shape_cast %126 : vector<16xf32> to vector<16x1xf32>
    %cst_52 = arith.constant 6.400000e+01 : f32
    %128 = vector.broadcast %cst_52 : f32 to vector<16x1xf32>
    %129 = arith.divf %127, %128 : vector<16x1xf32>
    %130 = vector.broadcast %129 : vector<16x1xf32> to vector<16x64xf32>
    %131 = arith.subf %123, %130 : vector<16x64xf32>
    %132 = arith.mulf %131, %131 : vector<16x64xf32>
    %cst_53 = arith.constant dense<0.000000e+00> : vector<16xf32>
    %133 = vector.multi_reduction <add>, %132, %cst_53 [1] : vector<16x64xf32> to vector<16xf32>
    %134 = vector.shape_cast %133 : vector<16xf32> to vector<16x1xf32>
    %cst_54 = arith.constant 6.400000e+01 : f32
    %135 = vector.broadcast %cst_54 : f32 to vector<16x1xf32>
    %136 = arith.divf %134, %135 : vector<16x1xf32>
    %137 = vector.broadcast %129 : vector<16x1xf32> to vector<16x64xf32>
    %138 = arith.subf %123, %137 : vector<16x64xf32>
    %cst_55 = arith.constant 9.99999974E-6 : f32
    %139 = vector.broadcast %cst_55 : f32 to vector<16x1xf32>
    %140 = arith.addf %136, %139 : vector<16x1xf32>
    %141 = math.rsqrt %140 : vector<16x1xf32>
    %142 = vector.broadcast %141 : vector<16x1xf32> to vector<16x64xf32>
    %143 = arith.mulf %138, %142 : vector<16x64xf32>
    %144 = vector.broadcast %124 : vector<1x64xf32> to vector<16x64xf32>
    %145 = arith.mulf %143, %144 : vector<16x64xf32>
    %146 = vector.broadcast %125 : vector<1x64xf32> to vector<16x64xf32>
    %147 = arith.addf %145, %146 : vector<16x64xf32>
    %c0_56 = arith.constant 0 : index
    %c384 = arith.constant 384 : index
    %148 = vector.load %arg4[%c0_56, %c384] : memref<64x576xbf16, #tpu.memory_space<vmem>>, vector<64x128xbf16>
    %149 = arith.truncf %147 : vector<16x64xf32> to vector<16x64xbf16>
    %cst_57 = arith.constant dense<0.000000e+00> : vector<16x128xf32>
    %150 = tpu.matmul %149, %148, %cst_57 {dimension_numbers = #tpu.dot_dimension_numbers<[1], [0], [0], [1], [0, 0, 1, 1], [], []>} : vector<16x64xbf16>, vector<64x128xbf16>, vector<16x128xf32> -> vector<16x128xf32>
    %c13 = arith.constant 13 : index
    %c0_58 = arith.constant 0 : index
    %151 = vector.load %arg6[%c13, %c0_58] : memref<24x128xf32, #tpu.memory_space<vmem>>, vector<1x128xf32>
    %152 = vector.broadcast %151 : vector<1x128xf32> to vector<16x128xf32>
    %153 = arith.addf %150, %152 : vector<16x128xf32>
    %c0_59 = arith.constant 0 : index
    %c0_60 = arith.constant 0 : index
    %154 = vector.load %arg7[%c0_59, %c0_60] : memref<16x128xf32, #tpu.memory_space<vmem>>, vector<16x128xf32>
    tpu.vector_store %arg7[%c0_59, %c0_60], %153 {strides = array<i32>} : memref<16x128xf32, #tpu.memory_space<vmem>>, vector<16x128xf32>,
    return
  }
  func.func @transform_0(%arg0: i32) -> (i32, i32) {
    %c0_i32 = arith.constant 0 : i32
    %c0_i32_0 = arith.constant 0 : i32
    %c0_i32_1 = arith.constant 0 : i32
    return %c0_i32, %c0_i32_0 : i32, i32
  }
  func.func @transform_1(%arg0: i32) -> (i32, i32) {
    %c0_i32 = arith.constant 0 : i32
    %c0_i32_0 = arith.constant 0 : i32
    %c0_i32_1 = arith.constant 0 : i32
    return %c0_i32, %c0_i32_0 : i32, i32
  }
  func.func @transform_2(%arg0: i32) -> (i32, i32) {
    %c0_i32 = arith.constant 0 : i32
    %c0_i32_0 = arith.constant 0 : i32
    %c0_i32_1 = arith.constant 0 : i32
    return %c0_i32, %c0_i32_0 : i32, i32
  }
  func.func @transform_3(%arg0: i32) -> (i32, i32) {
    %c0_i32 = arith.constant 0 : i32
    %c0_i32_0 = arith.constant 0 : i32
    %c0_i32_1 = arith.constant 0 : i32
    return %c0_i32, %c0_i32_0 : i32, i32
  }
  func.func @transform_4(%arg0: i32) -> (i32, i32) {
    %c0_i32 = arith.constant 0 : i32
    %c0_i32_0 = arith.constant 0 : i32
    %c0_i32_1 = arith.constant 0 : i32
    return %c0_i32, %c0_i32_0 : i32, i32
  }
  func.func @transform_5(%arg0: i32) -> (i32, i32) {
    %c0_i32 = arith.constant 0 : i32
    %c0_i32_0 = arith.constant 0 : i32
    %c0_i32_1 = arith.constant 0 : i32
    return %c0_i32, %c0_i32_0 : i32, i32
  }
  func.func @transform_6(%arg0: i32) -> (i32, i32) {
    %c0_i32 = arith.constant 0 : i32
    %c0_i32_0 = arith.constant 0 : i32
    %c0_i32_1 = arith.constant 0 : i32
    return %c0_i32, %c0_i32_0 : i32, i32
  }
}

</mosaic_0001>

<bundles_post_ra>
// kernel: gencad_super_forward.1
= control target key start
LH: loop header
LB: loop body
LE: loop exit
PB: predicated region body
PF: predicated region fallthrough
CT: control target
= control target key end

     0   :  { %v1685_v0 = vmov 0   ;;  %vm147_vm0 = vcmask 523264   ;;  %v1686_v17 = vmov 0.0   ;;  %vm1687_vm1 = vmmov 0   ;;  %s2152_s2 = inlined_call_operand.vmem [shape: bf16[192,64], index: 2, kind: input, shape index: {}]   ;;  %s2153_s0 = inlined_call_operand.vmem [shape: bf16[32,192], index: 0, kind: input, shape index: {}]   ;;  %s2154_s3 = inlined_call_operand.vmem [shape: bf16[64,576], index: 3, kind: input, shape index: {}]   ;;  %s2155_s4 = inlined_call_operand.vmem [shape: bf16[256,64], index: 4, kind: input, shape index: {}]   ;;  %s2156_s5 = inlined_call_operand.vmem [shape: f32[24,128], index: 5, kind: input, shape index: {}]   ;;  %s2157_s1 = inlined_call_operand.vmem [shape: f32[2,64], index: 1, kind: input, shape index: {}]   ;;  %s2158_s6 = inlined_call_operand.vmem [shape: f32[16,128], index: 6, kind: output, shape index: {}]  }
   0x1   :  { %154 = vmatprep.subr.bf16.mxu0 %v1685_v0  ;;  %v1623_v1 = vld [vmem:[%s2152_s2] sm:$0xff]   ;;  %v1624_v2 = vld [vmem:[%s2152_s2 + $0x8] sm:$0xff]   ;;  %v1625_v3 = vld [vmem:[%s2152_s2 + $0x10] sm:$0xff]   ;;  %1423 = vmatprep.subr.bf16.mxu1 %v1686_v17  ;;  %vm247_vm2 = vcmask 1041409  }
   0x2   :  { %155 = vmatpush1.bf16.msra.mxu0 %v1623_v1  ;;  %v1626_v4 = vld [vmem:[%s2152_s2 + $0x18] sm:$0xff]   ;;  %v1637_v5 = vld [vmem:[%s2153_s0 + $0x4] ss:$8 sps:$4 sm:$0xff]   ;;  %v1629_v8 = vld [vmem:[%s2152_s2 + $0x30] sm:$0xff]   ;;  %1431 = vmatprep.mubr.msk.bf16.mxu1 %vm1687_vm1, %v1686_v17 }
   0x3   :  { %156 = vmatprep.subr.bf16.mxu0 %v1685_v0  ;;  %v1627_v6 = vld [vmem:[%s2152_s2 + $0x20] sm:$0xff]   ;;  %1283 = vmatprep.mubr.msk.bf16.mxu0 %vm147_vm0, %v1637_v5  ;;  %v1628_v7 = vld [vmem:[%s2152_s2 + $0x28] sm:$0xff]   ;;  %v1630_v9 = vld [vmem:[%s2152_s2 + $0x38] sm:$0xff]  }
   0x4   :  { %v1631_v10 = vld [vmem:[%s2152_s2 + $0x40] sm:$0xff]   ;;  %v1632_v11 = vld [vmem:[%s2152_s2 + $0x48] sm:$0xff]   ;;  %v1633_v12 = vld [vmem:[%s2152_s2 + $0x50] sm:$0xff]  }
   0x5   :  { %v1634_v13 = vld [vmem:[%s2152_s2 + $0x58] sm:$0xff]   ;;  %v1635_v14 = vld [vmem:[%s2153_s0] ss:$8 sps:$4 sm:$0xff]   ;;  %v1813_v24 = vld [vmem:[%s2154_s3 + $0x50] ss:$20 sps:$4 sm:$0xff]  }
   0x6   :  { %157 = vmatpush1.bf16.msra.mxu0 %v1624_v2  ;;  %v1638_v15 = vld [vmem:[%s2153_s0 + $0x14] ss:$8 sps:$4 sm:$0xff]   ;;  %v1640_v16 = vld [vmem:[%s2153_s0 + $0x10] ss:$8 sps:$4 sm:$0xff]   ;;  %v1642_v19 = vld [vmem:[%s2154_s3 + $0x2c] ss:$20 sps:$4 sm:$0xff]  }
   0x7   :  { %158 = vmatprep.subr.bf16.mxu0 %v1685_v0  ;;  %v1641_v18 = vld [vmem:[%s2154_s3 + $0x4] ss:$20 sps:$4 sm:$0xff]   ;;  %v1643_v20 = vld [vmem:[%s2154_s3 + $0x54] ss:$20 sps:$4 sm:$0xff]   ;;  %v1644_v21 = vld [vmem:[%s2154_s3 + $0x7c] ss:$20 sps:$4 sm:$0xff]  }
   0x8   :  { %1424 = vmatpush3.bf16.msra.mxu1 %v1641_v18  ;;  %v1799_v22 = vld [vmem:[%s2154_s3] ss:$20 sps:$4 sm:$0xff]   ;;  %v1806_v23 = vld [vmem:[%s2154_s3 + $0x28] ss:$20 sps:$4 sm:$0xff]   ;;  %v1820_v25 = vld [vmem:[%s2154_s3 + $0x78] ss:$20 sps:$4 sm:$0xff]  }
   0x9   :  { %1425 = vmatprep.subr.bf16.mxu1 %v1686_v17  ;;  %v1266_v26 = vld [vmem:[%s2156_s5] ss:$0 sm:$0xff] }
   0xa   :  { %159 = vmatpush1.bf16.msra.mxu0 %v1625_v3  ;;  %v1842_v5 = vld [vmem:[%s2157_s1] sm:$0x3] }
   0xb   :  { %160 = vmatprep.subr.bf16.mxu0 %v1685_v0 }
   0xc   :  { %1426 = vmatpush3.bf16.msra.mxu1 %v1642_v19 }
   0xd   :  { %1427 = vmatprep.subr.bf16.mxu1 %v1686_v17 }
   0xe   :  { %161 = vmatpush1.bf16.msra.mxu0 %v1626_v4 }
   0xf   :  { %162 = vmatprep.subr.bf16.mxu0 %v1685_v0 }
  0x10   :  { %1428 = vmatpush3.bf16.msra.mxu1 %v1643_v20  ;;  %v412_v20 = vlaneseq }
  0x11   :  { %1429 = vmatprep.subr.bf16.mxu1 %v1686_v17 }
  0x12   :  { %163 = vmatpush1.bf16.msra.mxu0 %v1627_v6  ;;  %v344_v6 = vpack.c.bf16 %v1842_v5, %v1842_v5 }
  0x13   :  { %164 = vmatprep.subr.bf16.mxu0 %v1685_v0 }
  0x14   :  { %1430 = vmatpush3.bf16.msra.mxu1 %v1644_v21  ;;  %v1908_v21 = vshrl.u32 %v412_v20, 7 }
  0x15   :  { %1435 = vmatprep.subr.bf16.mxu1 %v1686_v17 }
  0x16   :  { %165 = vmatpush1.bf16.msra.mxu0 %v1628_v7  ;;  %v1851_v7 = vld [vmem:[%s2155_s4] sm:$0xff]  }
  0x17   :  { %166 = vmatprep.subr.bf16.mxu0 %v1685_v0 }
  0x1a   :  { %167 = vmatpush1.bf16.msra.mxu0 %v1629_v8  ;;  %v1859_v8 = vld [vmem:[%s2155_s4 + $0x8] sm:$0xff]  }
  0x1b   :  { %168 = vmatprep.subr.bf16.mxu0 %v1685_v0 }
  0x1e   :  { %169 = vmatpush1.bf16.msra.mxu0 %v1630_v9  ;;  %v1869_v9 = vld [vmem:[%s2155_s4 + $0x10] sm:$0xff]  }
  0x1f   :  { %170 = vmatprep.subr.bf16.mxu0 %v1685_v0 }
  0x22   :  { %171 = vmatpush1.bf16.msra.mxu0 %v1631_v10  ;;  %v1876_v10 = vld [vmem:[%s2155_s4 + $0x18] sm:$0xff]  }
  0x23   :  { %172 = vmatprep.subr.bf16.mxu0 %v1685_v0 }
  0x26   :  { %173 = vmatpush1.bf16.msra.mxu0 %v1632_v11  ;;  %v1882_v11 = vld [vmem:[%s2155_s4 + $0x20] sm:$0xff]  }
  0x27   :  { %174 = vmatprep.subr.bf16.mxu0 %v1685_v0 }
  0x2a   :  { %175 = vmatpush1.bf16.msra.mxu0 %v1633_v12  ;;  %v1889_v12 = vld [vmem:[%s2155_s4 + $0x28] sm:$0xff]  }
  0x2b   :  { %176 = vmatprep.subr.bf16.mxu0 %v1685_v0 }
  0x2e   :  { %177 = vmatpush1.bf16.msra.mxu0 %v1634_v13  ;;  %v1897_v13 = vld [vmem:[%s2155_s4 + $0x30] sm:$0xff]  }
  0x2f   :  { %1467 = vmatprep.subr.bf16.mxu0 %v1686_v17 }
  0x31   :  { %187 = vmatmul.mubr.bf16.vlgmr.msra.gmra.mrb[0].mxu0 %v1635_v14  ;;  %v1904_v14 = vld [vmem:[%s2155_s4 + $0x38] sm:$0xff]  }
  0x32   :  { %1284 = vmatprep.mubr.msk.bf16.mxu0 %vm147_vm0, %v1638_v15  ;;  %1468 = vmatpush3.bf16.msra.mxu0 %v1799_v22 }
  0x33   :  { %1469 = vmatprep.subr.bf16.mxu0 %v1686_v17 }
  0x36   :  { %1470 = vmatpush3.bf16.msra.mxu0 %v1806_v23 }
  0x37   :  { %1471 = vmatprep.subr.bf16.mxu0 %v1686_v17 }
  0x39   :  { %195 = vmatmul.mubr.bf16.gmra.mrb[4].mxu0 %v1640_v16 }
  0x3a   :  { %1475 = vmatprep.mubr.msk.bf16.mxu0 %vm1687_vm1, %v1686_v17  ;;  %1472 = vmatpush3.bf16.msra.mxu0 %v1813_v24 }
  0x3b   :  { %1473 = vmatprep.subr.bf16.mxu0 %v1686_v17 }
  0x3e   :  { %1474 = vmatpush3.bf16.msra.mxu0 %v1820_v25 }
  0x3f   :  { %1479 = vmatprep.subr.bf16.mxu0 %v1686_v17 }
 0x104   :  { %v188_v27 = vpop.f32.mrb[0].mxu0 }
 0x105   :  { %v189_v28 = vadd.f32 %v1266_v26, %v188_v27  ;;  %v190_v29 = vpop.f32.mrb[1].mxu0  ;;  %v1285_v27 = vld [vmem:[%s2156_s5 + $0x1] ss:$0 sm:$0xff] }
 0x106   :  { %v191_v30 = vpop.f32.mrb[2].mxu0 }
 0x107   :  { %v203_v31 = vmax.f32 %v189_v28, 0.0  ;;  %v192_v32 = vadd.f32 %v1266_v26, %v191_v30  ;;  %v193_v33 = vpop.f32.mrb[3].mxu0  ;;  %v1919_v28 = vld [vmem:[%s2156_s5 + $0x2] sm:$0xf] }
 0x109   :  { %v204_v34 = vmax.f32 %v192_v32, 0.0  ;;  %v207_v35 = vsel %vm147_vm0, %v203_v31, 0.0 }
 0x10b   :  { %v208_v36 = vsel %vm147_vm0, %v204_v34, 0.0 }
 0x10c   :  { %v209_v37 = vadd.f32 %v208_v36, %v207_v35  ;;  %v196_v38 = vpop.f32.mrb[4].mxu0 }
 0x10d   :  { %v197_v39 = vadd.f32 %v1266_v26, %v196_v38  ;;  %v198_v40 = vpop.f32.mrb[5].mxu0 }
 0x10e   :  { %v210_v41 = vrot.slane %v209_v37, 4  ;;  %v199_v42 = vpop.f32.mrb[6].mxu0 }
 0x10f   :  { %v205_v43 = vmax.f32 %v197_v39, 0.0  ;;  %v200_v44 = vadd.f32 %v1266_v26, %v199_v42  ;;  %v201_v45 = vpop.f32.mrb[7].mxu0  ;;  %v1911_v26 = vsub.s32 0, %v1908_v21  ;;  %v1939_v39 = vld [vmem:[%s2156_s5 + $0x6] ss:$0 sm:$0xff] }
 0x110   :  { %v211_v46 = vadd.f32 %v210_v41, %v209_v37 }
 0x111   :  { %v206_v47 = vmax.f32 %v200_v44, 0.0  ;;  %v216_v49 = vsel %vm147_vm0, %v205_v43, 0.0  ;;  %v415_v30 = vrot.slane %v1919_v28, %v1911_v26 }
 0x112   :  { %v212_v48 = vrot.slane %v211_v46, 2 }
 0x113   :  { %v217_v50 = vsel %vm147_vm0, %v206_v47, 0.0  ;;  %v558_v47 = vsub.s32 1, %v1908_v21 }
 0x114   :  { %v213_v51 = vadd.f32 %v212_v48, %v211_v46  ;;  %v218_v52 = vadd.f32 %v217_v50, %v216_v49 }
 0x115   :  { %v559_v48 = vrot.slane %v1919_v28, %v558_v47 }
 0x116   :  { %v214_v53 = vrot.slane %v213_v51, 1  ;;  %v219_v54 = vrot.slane %v218_v52, 4 }
 0x118   :  { %v220_v55 = vadd.f32 %v219_v54, %v218_v52  ;;  %v215_v56 = vadd.f32 %v214_v53, %v213_v51 }
 0x11a   :  { %v221_v57 = vrot.slane %v220_v55, 2  ;;  %v226_v59 = vmul.f32 0.0625, %v215_v56 }
 0x11c   :  { %v222_v58 = vadd.f32 %v221_v57, %v220_v55  ;;  %v236_v62 = vpack.c.bf16 %v226_v59, %v226_v59 }
 0x11e   :  { %v223_v60 = vrot.slane %v222_v58, 1  ;;  %v245_v1 = vunpack.c.l.b16 %v236_v62 }
 0x120   :  { %v224_v61 = vadd.f32 %v223_v60, %v222_v58 }
 0x122   :  { %v227_v63 = vmul.f32 0.0625, %v224_v61 }
 0x124   :  { %v237_v0 = vpack.c.bf16 %v227_v63, %v227_v63 }
 0x126   :  { %v246_v2 = vunpack.c.l.b16 %v237_v0 }
 0x128   :  { %v248_v3 = vsel %vm247_vm2, %v246_v2, %v245_v1 }
 0x129   :  { %v249_v4 = vpack.c.b16 %v248_v3, %v248_v3 }
 0x12b   :  { %1432 = vmatmul.mubr.msk.bf16.vlgmr.msra.gmra.mrb[0].mxu1 %vm147_vm0, %v249_v4 }
 0x12c   :  { %1436 = vmatpush3.bf16.msra.mxu1 %v1799_v22  ;;  %1443 = vmatprep.mubr.msk.bf16.mxu1 %vm1687_vm1, %v1686_v17 }
 0x12d   :  { %1437 = vmatprep.subr.bf16.mxu1 %v1686_v17 }
 0x130   :  { %1438 = vmatpush3.bf16.msra.mxu1 %v1806_v23 }
 0x131   :  { %1439 = vmatprep.subr.bf16.mxu1 %v1686_v17 }
 0x134   :  { %1440 = vmatpush3.bf16.msra.mxu1 %v1813_v24 }
 0x135   :  { %1441 = vmatprep.subr.bf16.mxu1 %v1686_v17 }
 0x138   :  { %1442 = vmatpush3.bf16.msra.mxu1 %v1820_v25 }
 0x139   :  { %1447 = vmatprep.subr.bf16.mxu1 %v1686_v17 }
 0x13b   :  { %1444 = vmatmul.mubr.msk.bf16.vlgmr.msra.gmra.mrb[4].mxu1 %vm147_vm0, %v344_v6 }
 0x13c   :  { %1448 = vmatpush3.bf16.msra.mxu1 %v1851_v7  ;;  %1463 = vmatprep.mubr.msk.bf16.mxu1 %vm1687_vm1, %v1686_v17 }
 0x13d   :  { %1449 = vmatprep.subr.bf16.mxu1 %v1686_v17 }
 0x140   :  { %1450 = vmatpush3.bf16.msra.mxu1 %v1859_v8 }
 0x141   :  { %1451 = vmatprep.subr.bf16.mxu1 %v1686_v17 }
 0x144   :  { %1452 = vmatpush3.bf16.msra.mxu1 %v1869_v9 }
 0x145   :  { %1453 = vmatprep.subr.bf16.mxu1 %v1686_v17 }
 0x148   :  { %1454 = vmatpush3.bf16.msra.mxu1 %v1876_v10 }
 0x149   :  { %1455 = vmatprep.subr.bf16.mxu1 %v1686_v17 }
 0x14c   :  { %1456 = vmatpush3.bf16.msra.mxu1 %v1882_v11 }
 0x14d   :  { %1457 = vmatprep.subr.bf16.mxu1 %v1686_v17 }
 0x150   :  { %1458 = vmatpush3.bf16.msra.mxu1 %v1889_v12 }
 0x151   :  { %1459 = vmatprep.subr.bf16.mxu1 %v1686_v17 }
 0x154   :  { %1460 = vmatpush3.bf16.msra.mxu1 %v1897_v13 }
 0x155   :  { %1461 = vmatprep.subr.bf16.mxu1 %v1686_v17 }
 0x158   :  { %1462 = vmatpush3.bf16.msra.mxu1 %v1904_v14 }
 0x159   :  { %1499 = vmatprep.subr.bf16.mxu1 %v1686_v17 }
 0x1fe   :  { %v311_v15 = vpop.f32.mrb[0].mxu1 }
 0x1ff   :  { %v1433_v16 = vpop.f32.mrb[1].mxu1  ;;  %v1921_v29 = vadd.f32 %v1285_v27, %v311_v15 }
 0x200   :  { %v314_v18 = vpop.f32.mrb[2].mxu1 }
 0x201   :  { %v1434_v19 = vpop.f32.mrb[3].mxu1 }
 0x20e   :  { %v406_v31 = vpop.f32.mrb[4].mxu1 }
 0x20f   :  { %v407_v32 = vadd.f32 %v406_v31, %v1921_v29  ;;  %v1445_v33 = vpop.f32.mrb[5].mxu1 }
 0x210   :  { %v409_v34 = vpop.f32.mrb[6].mxu1 }
 0x211   :  { %v416_v35 = vadd.f32 %v415_v30, %v407_v32  ;;  %v1446_v36 = vpop.f32.mrb[7].mxu1  ;;  %v1659_v34 = vld [vmem:[%s2154_s3 + $0x60] ss:$20 sps:$4 sm:$0xff]  }
 0x213   :  { %v417_v37 = vmax.f32 %v416_v35, 0.0 }
 0x215   :  { %v418_v38 = vpack.c.bf16 %v417_v37, %v417_v37 }
 0x217   :  { %1464 = vmatmul.mubr.bf16.vlgmr.msra.gmra.mrb[8].mxu1 %v418_v38 }
 0x218   :  { %1500 = vmatpush3.bf16.msra.mxu1 %v1799_v22  ;;  %1507 = vmatprep.mubr.msk.bf16.mxu1 %vm1687_vm1, %v1686_v17 }
 0x219   :  { %1501 = vmatprep.subr.bf16.mxu1 %v1686_v17 }
 0x21c   :  { %1502 = vmatpush3.bf16.msra.mxu1 %v1806_v23 }
 0x21d   :  { %1503 = vmatprep.subr.bf16.mxu1 %v1686_v17 }
 0x220   :  { %1504 = vmatpush3.bf16.msra.mxu1 %v1813_v24 }
 0x221   :  { %1505 = vmatprep.subr.bf16.mxu1 %v1686_v17 }
 0x224   :  { %1506 = vmatpush3.bf16.msra.mxu1 %v1820_v25 }
 0x225   :  { %1511 = vmatprep.subr.bf16.mxu1 %v1686_v17 }
 0x2ea   :  { %v505_v40 = vpop.f32.mrb[8].mxu1 }
 0x2eb   :  { %v506_v41 = vadd.f32 %v1939_v39, %v505_v40  ;;  %v1465_v42 = vpop.f32.mrb[9].mxu1 }
 0x2ec   :  { %v508_v43 = vpop.f32.mrb[10].mxu1  ;;  %v1688_v42 = vmov 1966171168  }
 0x2ed   :  { %v511_v44 = vsub.f32 %v1842_v5, %v506_v41  ;;  %v1466_v45 = vpop.f32.mrb[11].mxu1  ;;  %v867_v43 = vunpack.c.l.s4 %v1688_v42 }
 0x2ef   :  { %v512_v46 = vpack.c.bf16 %v511_v44, %v511_v44 }
 0x2f1   :  { %1476 = vmatmul.mubr.msk.bf16.vlgmr.msra.gmra.mrb[8].mxu0 %vm147_vm0, %v512_v46 }
 0x2f2   :  { %1480 = vmatpush3.bf16.msra.mxu0 %v1851_v7  ;;  %1495 = vmatprep.mubr.msk.bf16.mxu0 %vm1687_vm1, %v1686_v17 }
 0x2f3   :  { %1481 = vmatprep.subr.bf16.mxu0 %v1686_v17 }
 0x2f6   :  { %1482 = vmatpush3.bf16.msra.mxu0 %v1859_v8 }
 0x2f7   :  { %1483 = vmatprep.subr.bf16.mxu0 %v1686_v17 }
 0x2fa   :  { %1484 = vmatpush3.bf16.msra.mxu0 %v1869_v9 }
 0x2fb   :  { %1485 = vmatprep.subr.bf16.mxu0 %v1686_v17 }
 0x2fe   :  { %1486 = vmatpush3.bf16.msra.mxu0 %v1876_v10 }
 0x2ff   :  { %1487 = vmatprep.subr.bf16.mxu0 %v1686_v17 }
 0x302   :  { %1488 = vmatpush3.bf16.msra.mxu0 %v1882_v11 }
 0x303   :  { %1489 = vmatprep.subr.bf16.mxu0 %v1686_v17 }
 0x306   :  { %1490 = vmatpush3.bf16.msra.mxu0 %v1889_v12 }
 0x307   :  { %1491 = vmatprep.subr.bf16.mxu0 %v1686_v17 }
 0x30a   :  { %1492 = vmatpush3.bf16.msra.mxu0 %v1897_v13 }
 0x30b   :  { %1493 = vmatprep.subr.bf16.mxu0 %v1686_v17 }
 0x30e   :  { %1494 = vmatpush3.bf16.msra.mxu0 %v1904_v14 }
 0x30f   :  { %1531 = vmatprep.subr.bf16.mxu0 %v1686_v17 }
 0x3c4   :  { %v550_v49 = vpop.f32.mrb[8].mxu0 }
 0x3c5   :  { %v551_v50 = vadd.f32 %v550_v49, %v1921_v29  ;;  %v1477_v51 = vpop.f32.mrb[9].mxu0 }
 0x3c6   :  { %v553_v52 = vpop.f32.mrb[10].mxu0 }
 0x3c7   :  { %v560_v53 = vadd.f32 %v559_v48, %v551_v50  ;;  %v1478_v54 = vpop.f32.mrb[11].mxu0  ;;  %v864_v52 = vld [vmem:[%s2156_s5 + $0x10] sm:$0xff] }
 0x3c9   :  { %v561_v55 = vmax.f32 %v560_v53, 0.0 }
 0x3cb   :  { %v562_v56 = vpack.c.bf16 %v561_v55, %v561_v55 }
 0x3cd   :  { %1496 = vmatmul.mubr.bf16.vlgmr.msra.gmra.mrb[12].mxu0 %v562_v56 }
 0x3ce   :  { %1532 = vmatpush3.bf16.msra.mxu0 %v1799_v22  ;;  %1539 = vmatprep.mubr.msk.bf16.mxu0 %vm1687_vm1, %v1686_v17 }
 0x3cf   :  { %1533 = vmatprep.subr.bf16.mxu0 %v1686_v17 }
 0x3d2   :  { %1534 = vmatpush3.bf16.msra.mxu0 %v1806_v23  ;;  %v650_v23 = vsub.s32 2, %v1908_v21 }
 0x3d3   :  { %1535 = vmatprep.subr.bf16.mxu0 %v1686_v17 }
 0x3d6   :  { %1536 = vmatpush3.bf16.msra.mxu0 %v1813_v24  ;;  %v651_v24 = vrot.slane %v1919_v28, %v650_v23 }
 0x3d7   :  { %1537 = vmatprep.subr.bf16.mxu0 %v1686_v17 }
 0x3da   :  { %1538 = vmatpush3.bf16.msra.mxu0 %v1820_v25 }
 0x3db   :  { %1543 = vmatprep.subr.bf16.mxu0 %v1686_v17 }
 0x4a0   :  { %v597_v57 = vpop.f32.mrb[12].mxu0 }
 0x4a1   :  { %v598_v22 = vadd.f32 %v1939_v39, %v597_v57  ;;  %v1497_v58 = vpop.f32.mrb[13].mxu0 }
 0x4a2   :  { %v600_v59 = vpop.f32.mrb[14].mxu0 }
 0x4a3   :  { %v603_v60 = vsub.f32 %v511_v44, %v598_v22  ;;  %v1498_v61 = vpop.f32.mrb[15].mxu0  ;;  %v868_v44 = vunpack.c.0.s8 %v867_v43 }
 0x4a5   :  { %v604_v62 = vpack.c.bf16 %v603_v60, %v603_v60  ;;  %v871_v45 = vsub.s32 %v868_v44, %v1908_v21 }
 0x4a7   :  { %1508 = vmatmul.mubr.msk.bf16.vlgmr.msra.gmra.mrb[12].mxu1 %vm147_vm0, %v604_v62 }
 0x4a8   :  { %1512 = vmatpush3.bf16.msra.mxu1 %v1851_v7  ;;  %1527 = vmatprep.mubr.msk.bf16.mxu1 %vm1687_vm1, %v1686_v17 }
 0x4a9   :  { %1513 = vmatprep.subr.bf16.mxu1 %v1686_v17 }
 0x4ac   :  { %1514 = vmatpush3.bf16.msra.mxu1 %v1859_v8 }
 0x4ad   :  { %1515 = vmatprep.subr.bf16.mxu1 %v1686_v17 }
 0x4b0   :  { %1516 = vmatpush3.bf16.msra.mxu1 %v1869_v9 }
 0x4b1   :  { %1517 = vmatprep.subr.bf16.mxu1 %v1686_v17 }
 0x4b4   :  { %1518 = vmatpush3.bf16.msra.mxu1 %v1876_v10 }
 0x4b5   :  { %1519 = vmatprep.subr.bf16.mxu1 %v1686_v17 }
 0x4b8   :  { %1520 = vmatpush3.bf16.msra.mxu1 %v1882_v11 }
 0x4b9   :  { %1521 = vmatprep.subr.bf16.mxu1 %v1686_v17 }
 0x4bc   :  { %1522 = vmatpush3.bf16.msra.mxu1 %v1889_v12 }
 0x4bd   :  { %1523 = vmatprep.subr.bf16.mxu1 %v1686_v17 }
 0x4c0   :  { %1524 = vmatpush3.bf16.msra.mxu1 %v1897_v13 }
 0x4c1   :  { %1525 = vmatprep.subr.bf16.mxu1 %v1686_v17 }
 0x4c4   :  { %1526 = vmatpush3.bf16.msra.mxu1 %v1904_v14 }
 0x4c5   :  { %1563 = vmatprep.subr.bf16.mxu1 %v1686_v17 }
 0x57a   :  { %v642_v25 = vpop.f32.mrb[12].mxu1 }
 0x57b   :  { %v643_v63 = vadd.f32 %v642_v25, %v1921_v29  ;;  %v1509_v0 = vpop.f32.mrb[13].mxu1 }
 0x57c   :  { %v645_v1 = vpop.f32.mrb[14].mxu1  ;;  %v1661_v0 = vld [vmem:[%s2154_s3 + $0x8] ss:$20 sps:$4 sm:$0xff]  }
 0x57d   :  { %v652_v2 = vadd.f32 %v651_v24, %v643_v63  ;;  %v1510_v3 = vpop.f32.mrb[15].mxu1  ;;  %v1662_v1 = vld [vmem:[%s2154_s3 + $0x30] ss:$20 sps:$4 sm:$0xff]  }
 0x57e   :  { %v1664_v3 = vld [vmem:[%s2154_s3 + $0x80] ss:$20 sps:$4 sm:$0xff]  }
 0x57f   :  { %v653_v4 = vmax.f32 %v652_v2, 0.0  ;;  %v1663_v2 = vld [vmem:[%s2154_s3 + $0x58] ss:$20 sps:$4 sm:$0xff]  }
 0x581   :  { %v654_v5 = vpack.c.bf16 %v653_v4, %v653_v4  ;;  %v1665_v4 = vld [vmem:[%s2155_s4 + $0x40] sm:$0xff]  }
 0x583   :  { %1528 = vmatmul.mubr.bf16.vlgmr.msra.gmra.mrb[16].mxu1 %v654_v5  ;;  %v1666_v5 = vld [vmem:[%s2155_s4 + $0x48] sm:$0xff]  }
 0x584   :  { %1571 = vmatprep.mubr.msk.bf16.mxu1 %vm1687_vm1, %v1686_v17 }
 0x656   :  { %v689_v6 = vpop.f32.mrb[16].mxu1 }
 0x657   :  { %v690_v15 = vadd.f32 %v1939_v39, %v689_v6  ;;  %v1529_v16 = vpop.f32.mrb[17].mxu1  ;;  %v1667_v6 = vld [vmem:[%s2155_s4 + $0x50] sm:$0xff]  }
 0x658   :  { %v692_v18 = vpop.f32.mrb[18].mxu1  ;;  %v1669_v16 = vld [vmem:[%s2155_s4 + $0x60] sm:$0xff]  }
 0x659   :  { %v695_v19 = vsub.f32 %v603_v60, %v690_v15  ;;  %v1530_v20 = vpop.f32.mrb[19].mxu1  ;;  %v1668_v15 = vld [vmem:[%s2155_s4 + $0x58] sm:$0xff]   ;;  %v1670_v18 = vld [vmem:[%s2155_s4 + $0x68] sm:$0xff]  }
 0x65b   :  { %v696_v27 = vpack.c.bf16 %v695_v19, %v695_v19 }
 0x65d   :  { %1540 = vmatmul.mubr.msk.bf16.vlgmr.msra.gmra.mrb[16].mxu0 %vm147_vm0, %v696_v27 }
 0x65e   :  { %1544 = vmatpush3.bf16.msra.mxu0 %v1851_v7  ;;  %1559 = vmatprep.mubr.msk.bf16.mxu0 %vm1687_vm1, %v1686_v17  ;;  %v1657_v7 = vld [vmem:[%s2154_s3 + $0x10] ss:$20 sps:$4 sm:$0xff]  }
 0x65f   :  { %1545 = vmatprep.subr.bf16.mxu0 %v1686_v17  ;;  %1564 = vmatpush3.bf16.msra.mxu1 %v1657_v7 }
 0x660   :  { %1565 = vmatprep.subr.bf16.mxu1 %v1686_v17 }
 0x662   :  { %1546 = vmatpush3.bf16.msra.mxu0 %v1859_v8  ;;  %v1658_v8 = vld [vmem:[%s2154_s3 + $0x38] ss:$20 sps:$4 sm:$0xff]  }
 0x663   :  { %1547 = vmatprep.subr.bf16.mxu0 %v1686_v17  ;;  %1566 = vmatpush3.bf16.msra.mxu1 %v1658_v8 }
 0x664   :  { %1567 = vmatprep.subr.bf16.mxu1 %v1686_v17 }
 0x666   :  { %1548 = vmatpush3.bf16.msra.mxu0 %v1869_v9  ;;  %v742_v9 = vsub.s32 3, %v1908_v21 }
 0x667   :  { %1549 = vmatprep.subr.bf16.mxu0 %v1686_v17  ;;  %1568 = vmatpush3.bf16.msra.mxu1 %v1659_v34 }
 0x668   :  { %1569 = vmatprep.subr.bf16.mxu1 %v1686_v17 }
 0x66a   :  { %1550 = vmatpush3.bf16.msra.mxu0 %v1876_v10  ;;  %v743_v10 = vrot.slane %v1919_v28, %v742_v9  ;;  %v1660_v28 = vld [vmem:[%s2154_s3 + $0x88] ss:$20 sps:$4 sm:$0xff]  }
 0x66b   :  { %1551 = vmatprep.subr.bf16.mxu0 %v1686_v17  ;;  %1570 = vmatpush3.bf16.msra.mxu1 %v1660_v28 }
 0x66c   :  { %1575 = vmatprep.subr.bf16.mxu1 %v1686_v17 }
 0x66e   :  { %1552 = vmatpush3.bf16.msra.mxu0 %v1882_v11 }
 0x66f   :  { %1553 = vmatprep.subr.bf16.mxu0 %v1686_v17 }
 0x672   :  { %1554 = vmatpush3.bf16.msra.mxu0 %v1889_v12 }
 0x673   :  { %1555 = vmatprep.subr.bf16.mxu0 %v1686_v17 }
 0x676   :  { %1556 = vmatpush3.bf16.msra.mxu0 %v1897_v13 }
 0x677   :  { %1557 = vmatprep.subr.bf16.mxu0 %v1686_v17 }
 0x67a   :  { %1558 = vmatpush3.bf16.msra.mxu0 %v1904_v14 }
 0x67b   :  { %1587 = vmatprep.subr.bf16.mxu0 %v1686_v17 }
 0x730   :  { %v734_v11 = vpop.f32.mrb[16].mxu0 }
 0x731   :  { %v735_v12 = vadd.f32 %v734_v11, %v1921_v29  ;;  %v1541_v13 = vpop.f32.mrb[17].mxu0 }
 0x732   :  { %v737_v14 = vpop.f32.mrb[18].mxu0 }
 0x733   :  { %v744_v30 = vadd.f32 %v743_v10, %v735_v12  ;;  %v1542_v31 = vpop.f32.mrb[19].mxu0  ;;  %v1313_v12 = vld [vmem:[%s2156_s5 + $0x7] ss:$0 sm:$0xff] }
 0x734   :  { %v1314_v31 = vld [vmem:[%s2156_s5 + $0x8] ss:$0 sm:$0xff] }
 0x735   :  { %v745_v32 = vmax.f32 %v744_v30, 0.0 }
 0x737   :  { %v746_v33 = vpack.c.bf16 %v745_v32, %v745_v32 }
 0x739   :  { %1560 = vmatmul.mubr.bf16.vlgmr.msra.gmra.mrb[20].mxu0 %v746_v33 }
 0x73a   :  { %1603 = vmatprep.mubr.msk.bf16.mxu0 %vm1687_vm1, %v1686_v17  ;;  %1588 = vmatpush3.bf16.msra.mxu0 %v1665_v4 }
 0x73b   :  { %1589 = vmatprep.subr.bf16.mxu0 %v1686_v17 }
 0x73e   :  { %1590 = vmatpush3.bf16.msra.mxu0 %v1666_v5 }
 0x73f   :  { %1591 = vmatprep.subr.bf16.mxu0 %v1686_v17 }
 0x742   :  { %1592 = vmatpush3.bf16.msra.mxu0 %v1667_v6 }
 0x743   :  { %1593 = vmatprep.subr.bf16.mxu0 %v1686_v17 }
 0x746   :  { %1594 = vmatpush3.bf16.msra.mxu0 %v1668_v15 }
 0x747   :  { %1595 = vmatprep.subr.bf16.mxu0 %v1686_v17 }
 0x74a   :  { %1596 = vmatpush3.bf16.msra.mxu0 %v1669_v16  ;;  %v1330_v16 = vld [vmem:[%s2156_s5 + $0xb] ss:$0 sm:$0xff] }
 0x74b   :  { %1597 = vmatprep.subr.bf16.mxu0 %v1686_v17 }
 0x74e   :  { %1598 = vmatpush3.bf16.msra.mxu0 %v1670_v18 }
 0x74f   :  { %1599 = vmatprep.subr.bf16.mxu0 %v1686_v17 }
 0x80c   :  { %v781_v29 = vpop.f32.mrb[20].mxu0 }
 0x80d   :  { %v782_v35 = vadd.f32 %v1939_v39, %v781_v29  ;;  %v1561_v36 = vpop.f32.mrb[21].mxu0  ;;  %v1671_v29 = vld [vmem:[%s2155_s4 + $0x70] sm:$0xff]  }
 0x80e   :  { %v784_v37 = vpop.f32.mrb[22].mxu0  ;;  %1600 = vmatpush3.bf16.msra.mxu0 %v1671_v29  ;;  %v1315_v36 = vld [vmem:[%s2156_s5 + $0x9] ss:$0 sm:$0xff] }
 0x80f   :  { %v787_v38 = vsub.f32 %v695_v19, %v782_v35  ;;  %v1562_v40 = vpop.f32.mrb[23].mxu0  ;;  %1601 = vmatprep.subr.bf16.mxu0 %v1686_v17  ;;  %v1672_v35 = vld [vmem:[%s2155_s4 + $0x78] sm:$0xff]  }
 0x811   :  { %v796_v41 = vpack.c.bf16 %v787_v38, %v787_v38 }
 0x812   :  { %1602 = vmatpush3.bf16.msra.mxu0 %v1672_v35 }
 0x813   :  { %1572 = vmatmul.mubr.msk.bf16.vlgmr.msra.gmra.mrb[20].mxu1 %vm147_vm0, %v796_v41 }
 0x814   :  { %1583 = vmatprep.mubr.msk.bf16.mxu1 %vm1687_vm1, %v1686_v17  ;;  %1576 = vmatpush3.bf16.msra.mxu1 %v1661_v0  ;;  %v1676_v0 = vld [vmem:[%s2154_s3 + $0x84] ss:$20 sps:$4 sm:$0xff]  }
 0x815   :  { %1577 = vmatprep.subr.bf16.mxu1 %v1686_v17 }
 0x818   :  { %1578 = vmatpush3.bf16.msra.mxu1 %v1662_v1 }
 0x819   :  { %1579 = vmatprep.subr.bf16.mxu1 %v1686_v17 }
 0x81c   :  { %1580 = vmatpush3.bf16.msra.mxu1 %v1663_v2 }
 0x81d   :  { %1581 = vmatprep.subr.bf16.mxu1 %v1686_v17 }
 0x820   :  { %1582 = vmatpush3.bf16.msra.mxu1 %v1664_v3 }
 0x821   :  { %1607 = vmatprep.subr.bf16.mxu1 %v1686_v17 }
 0x8e6   :  { %v858_v46 = vpop.f32.mrb[20].mxu1 }
 0x8e7   :  { %v872_v47 = vrot.slane %v858_v46, %v871_v45  ;;  %v1573_v48 = vpop.f32.mrb[21].mxu1 }
 0x8e8   :  { %v861_v49 = vpop.f32.mrb[22].mxu1 }
 0x8e9   :  { %v873_v39 = vcombine.high %v872_v47, %v872_v47  ;;  %v880_v50 = vrot.slane %v872_v47, %v871_v45  ;;  %v1574_v51 = vpop.f32.mrb[23].mxu1  ;;  %v1321_v47 = vld [vmem:[%s2156_s5 + $0xa] ss:$0 sm:$0xff] }
 0x8eb   :  { %v887_v53 = vrot.slane %v873_v39, %v871_v45  ;;  %v891_v54 = vrot.slane %v880_v50, %v1911_v26 }
 0x8ed   :  { %v898_v55 = vadd.f32 %v891_v54, %v864_v52  ;;  %v895_v56 = vrot.slane %v887_v53, %v1911_v26 }
 0x8ef   :  { %v902_v57 = vsel %vm147_vm0, %v898_v55, 0.0  ;;  %v899_v21 = vadd.f32 %v895_v56, %v864_v52 }
 0x8f0   :  { %903 = vadd.xlane.f32.xlu0 %v902_v57 }
 0x8f1   :  { %v905_v22 = vsel %vm147_vm0, %v899_v21, 0.0 }
 0x8f4   :  { %906 = vadd.xlane.f32.xlu0 %v905_v22 }
 0x97d   :  { %v904_v58 = vpop.xlane.xlu0 %903 }
 0x97e   :  { %v909_v59 = vmul.f32 0.015625, %v904_v58 }
 0x980   :  { %v911_v60 = vsub.f32 %v898_v55, %v909_v59 }
 0x981   :  { %v907_v61 = vpop.xlane.xlu0 %906 }
 0x982   :  { %v910_v62 = vmul.f32 0.015625, %v907_v61  ;;  %v913_v23 = vmul.f32 %v911_v60, %v911_v60 }
 0x984   :  { %v912_v24 = vsub.f32 %v899_v21, %v910_v62  ;;  %v915_v25 = vsel %vm147_vm0, %v913_v23, 0.0 }
 0x985   :  { %916 = vadd.xlane.f32.xlu1 %v915_v25  ;;  %v1673_v25 = vld [vmem:[%s2154_s3 + $0xc] ss:$20 sps:$4 sm:$0xff]  }
 0x986   :  { %v914_v63 = vmul.f32 %v912_v24, %v912_v24 }
 0x988   :  { %v918_v26 = vsel %vm147_vm0, %v914_v63, 0.0  ;;  %v1674_v63 = vld [vmem:[%s2154_s3 + $0x34] ss:$20 sps:$4 sm:$0xff]  }
 0x989   :  { %919 = vadd.xlane.f32.xlu1 %v918_v26  ;;  %v1675_v26 = vld [vmem:[%s2154_s3 + $0x5c] ss:$20 sps:$4 sm:$0xff]  }
 0xa12   :  { %v917_v19 = vpop.xlane.xlu1 %916 }
 0xa13   :  { %v921_v20 = vmul.f32 0.015625, %v917_v19 }
 0xa15   :  { %v923_v27 = vadd.f32 1e-05, %v921_v20 }
 0xa16   :  { %v920_v7 = vpop.xlane.xlu1 %919 }
 0xa17   :  { %1677 = vrsqrt.f32 %v923_v27  ;;  %v922_v8 = vmul.f32 0.015625, %v920_v7  ;;  %v1331_v27 = vld [vmem:[%s2156_s5 + $0xc] ss:$0 sm:$0xff] }
 0xa19   :  { %v924_v9 = vadd.f32 1e-05, %v922_v8 }
 0xa1b   :  { %1679 = vrsqrt.f32 %v924_v9 }
 0xa21   :  { %v1678_v10 = vpop.eup %1677 }
 0xa22   :  { %v927_v11 = vmul.f32 %v1678_v10, %v911_v60 }
 0xa24   :  { %v933_v14 = vmul.f32 %v1313_v12, %v927_v11  ;;  %v1332_v11 = vld [vmem:[%s2156_s5 + $0xd] ss:$0 sm:$0xff] }
 0xa25   :  { %v1680_v13 = vpop.eup %1679 }
 0xa26   :  { %v928_v30 = vmul.f32 %v1680_v13, %v912_v24  ;;  %v939_v33 = vadd.f32 %v1314_v31, %v933_v14 }
 0xa28   :  { %v934_v32 = vmul.f32 %v1313_v12, %v928_v30 }
 0xa2a   :  { %v940_v34 = vadd.f32 %v1314_v31, %v934_v32 }
 0xa2c   :  { %v949_v28 = vpack.c.bf16 %v940_v34, %v939_v33 }
 0xa2e   :  { %1584 = vmatmul.mubr.msk.bf16.vlgmr.msra.gmra.mrb[24].mxu1 %vm147_vm0, %v949_v28 }
 0xa2f   :  { %1615 = vmatprep.mubr.msk.bf16.mxu1 %vm1687_vm1, %v1686_v17  ;;  %1608 = vmatpush3.bf16.msra.mxu1 %v1673_v25 }
 0xa30   :  { %1609 = vmatprep.subr.bf16.mxu1 %v1686_v17 }
 0xa33   :  { %1610 = vmatpush3.bf16.msra.mxu1 %v1674_v63 }
 0xa34   :  { %1611 = vmatprep.subr.bf16.mxu1 %v1686_v17 }
 0xa37   :  { %1612 = vmatpush3.bf16.msra.mxu1 %v1675_v26 }
 0xa38   :  { %1613 = vmatprep.subr.bf16.mxu1 %v1686_v17 }
 0xa3b   :  { %1614 = vmatpush3.bf16.msra.mxu1 %v1676_v0 }
 0xb01   :  { %v1016_v37 = vpop.f32.mrb[24].mxu1 }
 0xb02   :  { %v1017_v38 = vadd.f32 %v1315_v36, %v1016_v37  ;;  %v1585_v40 = vpop.f32.mrb[25].mxu1 }
 0xb03   :  { %v1019_v41 = vpop.f32.mrb[26].mxu1 }
 0xb04   :  { %v1020_v42 = vadd.f32 %v1315_v36, %v1019_v41  ;;  %v1586_v43 = vpop.f32.mrb[27].mxu1  ;;  %v1023_v44 = vmax.f32 %v1017_v38, 0.0 }
 0xb06   :  { %v1024_v45 = vmax.f32 %v1020_v42, 0.0 }
 0xb08   :  { %v1041_v46 = vpack.c.bf16 %v1024_v45, %v1023_v44 }
 0xb0a   :  { %1604 = vmatmul.mubr.bf16.vlgmr.msra.gmra.mrb[24].mxu0 %v1041_v46 }
 0xbdd   :  { %v1129_v48 = vpop.f32.mrb[24].mxu0 }
 0xbde   :  { %v1130_v49 = vadd.f32 %v1321_v47, %v1129_v48  ;;  %v1605_v39 = vpop.f32.mrb[25].mxu0 }
 0xbdf   :  { %v1132_v50 = vpop.f32.mrb[26].mxu0 }
 0xbe0   :  { %v1133_v51 = vadd.f32 %v1321_v47, %v1132_v50  ;;  %v1606_v52 = vpop.f32.mrb[27].mxu0  ;;  %v1136_v53 = vadd.f32 %v1130_v49, %v939_v33 }
 0xbe2   :  { %v1140_v54 = vsel %vm147_vm0, %v1136_v53, 0.0  ;;  %v1137_v55 = vadd.f32 %v1133_v51, %v940_v34 }
 0xbe3   :  { %1141 = vadd.xlane.f32.xlu0 %v1140_v54 }
 0xbe4   :  { %v1143_v56 = vsel %vm147_vm0, %v1137_v55, 0.0 }
 0xbe5   :  { %1144 = vadd.xlane.f32.xlu1 %v1143_v56 }
 0xc70   :  { %v1142_v57 = vpop.xlane.xlu0 %1141 }
 0xc71   :  { %v1146_v21 = vmul.f32 0.015625, %v1142_v57 }
 0xc72   :  { %v1145_v22 = vpop.xlane.xlu1 %1144 }
 0xc73   :  { %v1148_v58 = vsub.f32 %v1136_v53, %v1146_v21  ;;  %v1147_v59 = vmul.f32 0.015625, %v1145_v22 }
 0xc75   :  { %v1149_v60 = vsub.f32 %v1137_v55, %v1147_v59  ;;  %v1150_v61 = vmul.f32 %v1148_v58, %v1148_v58 }
 0xc77   :  { %v1152_v62 = vsel %vm147_vm0, %v1150_v61, 0.0  ;;  %v1151_v23 = vmul.f32 %v1149_v60, %v1149_v60 }
 0xc78   :  { %1153 = vadd.xlane.f32.xlu0 %v1152_v62 }
 0xc79   :  { %v1155_v24 = vsel %vm147_vm0, %v1151_v23, 0.0 }
 0xc7a   :  { %1156 = vadd.xlane.f32.xlu1 %v1155_v24 }
 0xd05   :  { %v1154_v1 = vpop.xlane.xlu0 %1153 }
 0xd06   :  { %v1158_v2 = vmul.f32 0.015625, %v1154_v1 }
 0xd07   :  { %v1157_v3 = vpop.xlane.xlu1 %1156 }
 0xd08   :  { %v1160_v4 = vadd.f32 1e-05, %v1158_v2  ;;  %v1159_v5 = vmul.f32 0.015625, %v1157_v3 }
 0xd0a   :  { %1681 = vrsqrt.f32 %v1160_v4  ;;  %v1161_v6 = vadd.f32 1e-05, %v1159_v5 }
 0xd0c   :  { %1683 = vrsqrt.f32 %v1161_v6 }
 0xd14   :  { %v1682_v15 = vpop.eup %1681 }
 0xd15   :  { %v1164_v18 = vmul.f32 %v1682_v15, %v1148_v58 }
 0xd16   :  { %v1684_v17 = vpop.eup %1683 }
 0xd17   :  { %v1170_v19 = vmul.f32 %v1330_v16, %v1164_v18  ;;  %v1165_v20 = vmul.f32 %v1684_v17, %v1149_v60 }
 0xd19   :  { %v1171_v7 = vmul.f32 %v1330_v16, %v1165_v20  ;;  %v1176_v8 = vadd.f32 %v1331_v27, %v1170_v19 }
 0xd1b   :  { %v1177_v9 = vadd.f32 %v1331_v27, %v1171_v7 }
 0xd1d   :  { %v1186_v10 = vpack.c.bf16 %v1177_v9, %v1176_v8 }
 0xd1f   :  { %1616 = vmatmul.mubr.msk.bf16.vlgmr.msra.gmra.mrb[28].mxu1 %vm147_vm0, %v1186_v10 }
 0xdf2   :  { %v1253_v12 = vpop.f32.mrb[28].mxu1 }
 0xdf3   :  { %v1254_v13 = vadd.f32 %v1332_v11, %v1253_v12  ;;  %v1617_v14 = vpop.f32.mrb[29].mxu1 }
 0xdf4   :  { %v1256_v30 = vpop.f32.mrb[30].mxu1 }
 0xdf5   :  { %1260 = vst [vmem:[%s2158_s6] sm:$0xff] %v1254_v13  ;;  %v1257_v31 = vadd.f32 %v1332_v11, %v1256_v30  ;;  %v1618_v32 = vpop.f32.mrb[31].mxu1 }
 0xdf7   :  { %1261 = vst [vmem:[%s2158_s6 + $0x8] sm:$0xff] %v1257_v31 }

</bundles_post_ra>
